<compile_context>
chip_gen: v7x
topology: tpu7x:2x2x1
jax: 0.10.0
libtpu: 0.0.40
codegen_flags: <defaults>
</compile_context>

<pallas_src>
import functools

import numpy as np
import jax
import jax.numpy as jnp
from jax.experimental import pallas as pl
from jax.experimental.pallas import tpu as pltpu


def _round_up(x, m):
    return ((x + m - 1) // m) * m


# ----------------------------- Pallas kernel ------------------------------


def _seq2seq_kernel(src_ref, tgt_ref, pool_ref, expand_ref,
                    w_enc_ref, w_dec_ref, b_ed_ref,
                    w_gen_ref, b_gen_ref, out_ref):
    """Fused encoder -> context -> decoder -> generator, whole batch at once.

    src_ref:    (B*Ls, Hp) bf16       tgt_ref:   (B*Lt, Hp) bf16
    pool_ref:   (B, B*Ls)  bf16       per-batch 1/Ls mean-pool rows
    expand_ref: (B*Lt, B)  bf16       one-hot row replication
    w_enc_ref:  (Hp, Hp)   bf16       w_dec_ref: (Hp, Hp) bf16
    b_ed_ref:   (2, Hp)    f32        row 0 = b_enc, row 1 = b_dec
    w_gen_ref:  (Hp, Vp)   bf16       b_gen_ref: (1, Vp) f32 (-1e30 on pad)
    out_ref:    (B*Lt, Vp) f32        log-probabilities (pad lanes ~ -1e30)
    """
    # Encoder: (B*Ls, Hp) @ (Hp, Hp), bf16 operands, f32 accumulation.
    enc = jnp.tanh(
        jnp.dot(src_ref[...], w_enc_ref[...],
                preferred_element_type=jnp.float32)
        + b_ed_ref[0:1, :]
    )

    # Per-batch mean context: (B, B*Ls) @ (B*Ls, Hp) -> (B, Hp), then
    # replicate each batch row Lt times: (B*Lt, B) @ (B, Hp).  Both on MXU,
    # no XLU cross-sublane reduce, no in-kernel reshape.
    ctx = jnp.dot(pool_ref[...], enc.astype(jnp.bfloat16),
                  preferred_element_type=jnp.float32)
    ctx_rep = jnp.dot(expand_ref[...], ctx.astype(jnp.bfloat16),
                      preferred_element_type=jnp.float32)

    # Decoder: add per-row context, project, tanh.
    h = (tgt_ref[...].astype(jnp.float32) + ctx_rep).astype(jnp.bfloat16)
    dec = jnp.tanh(
        jnp.dot(h, w_dec_ref[...], preferred_element_type=jnp.float32)
        + b_ed_ref[1:2, :]
    )

    # Generator: project to padded vocab + numerically-stable log_softmax.
    # Padded lanes carry a -1e30 bias so exp() kills them in the denominator.
    logits = (jnp.dot(dec.astype(jnp.bfloat16), w_gen_ref[...],
                      preferred_element_type=jnp.float32)
              + b_gen_ref[...])
    m = jnp.max(logits, axis=-1, keepdims=True)
    lse = jnp.log(jnp.sum(jnp.exp(logits - m), axis=-1, keepdims=True)) + m
    out_ref[...] = logits - lse          # lane-dense, unmasked vst


# ------------------------- parameter construction -------------------------


def init_params(key, *, vocab=32, special=8, hidden=32, param_init=0.1):
    """Mimics SimpleModel.initialize: uniform(-0.1, 0.1), then zero row 0 of
    the encoder/decoder special-embedding tables."""
    ks = jax.random.split(key, 9)
    u = lambda k, shape: jax.random.uniform(
        k, shape, jnp.float32, minval=-param_init, maxval=param_init)

    learned_emb = u(ks[0], (vocab, hidden))
    enc_special = u(ks[1], (special, hidden)).at[0].set(0.0)
    dec_special = u(ks[2], (special, hidden)).at[0].set(0.0)
    return {
        "learned_emb": learned_emb,
        "enc_special": enc_special,
        "dec_special": dec_special,
        "w_enc": u(ks[3], (hidden, hidden)),
        "b_enc": u(ks[4], (1, hidden)),
        "w_dec": u(ks[5], (hidden, hidden)),
        "b_dec": u(ks[6], (1, hidden)),
        "w_gen": u(ks[7], (hidden, vocab)),
        "b_gen": u(ks[8], (1, vocab)),
    }


def prepare_params(params):
    """One-time kernel-ready parameter prep (pad H->128, V->mult of 128, bf16).

    Padding with zeros keeps the math exact in the real lanes: padded hidden
    lanes of every activation stay 0 (tanh(0)=0) and padded vocab lanes carry
    a -1e30 bias so log_softmax ignores them.
    """
    H = params["w_enc"].shape[0]
    V = params["w_gen"].shape[1]
    HP = _round_up(H, 128)
    VP = _round_up(V, 128)

    pad_h = lambda x: jnp.pad(x, ((0, 0), (0, HP - H)))

    prepared = {
        "learned_emb": pad_h(params["learned_emb"]).astype(jnp.bfloat16),
        "enc_special": pad_h(params["enc_special"]).astype(jnp.bfloat16),
        "dec_special": pad_h(params["dec_special"]).astype(jnp.bfloat16),
        "w_enc": jnp.pad(params["w_enc"],
                         ((0, HP - H), (0, HP - H))).astype(jnp.bfloat16),
        "w_dec": jnp.pad(params["w_dec"],
                         ((0, HP - H), (0, HP - H))).astype(jnp.bfloat16),
        # merged encoder/decoder biases: one (2, HP) f32 operand.
        "b_encdec": jnp.concatenate(
            [pad_h(params["b_enc"]), pad_h(params["b_dec"])], axis=0),
        "w_gen": jnp.pad(params["w_gen"],
                         ((0, HP - H), (0, VP - V))).astype(jnp.bfloat16),
        "b_gen": jnp.full((1, VP), -1e30, jnp.float32).at[:, :V].set(
            params["b_gen"]),
    }
    return prepared


# ------------------------------ forward pass -------------------------------


@functools.partial(jax.jit, static_argnames=("vocab",))
def simple_model_forward(prepared, src_tok, src_special_tok,
                         tgt_tok, tgt_special_tok, *, vocab):
    """Token ids -> (B, Lt, vocab) log-probabilities.  Fully jitted."""
    B, Ls = src_tok.shape
    _, Lt = tgt_tok.shape
    HP = prepared["w_enc"].shape[0]
    VP = prepared["w_gen"].shape[1]

    # bf16 embedding gathers (tables are pre-padded/pre-cast) -- no f32
    # activation round-trip through HBM.
    src_flat = (prepared["learned_emb"][src_tok]
                + prepared["enc_special"][src_special_tok]).reshape(B * Ls, HP)
    tgt_flat = (prepared["learned_emb"][tgt_tok]
                + prepared["dec_special"][tgt_special_tok]).reshape(B * Lt, HP)

    # Compile-time constants (numpy -> baked into the executable):
    #   pool:   (B, B*Ls)  row b has 1/Ls over batch b's source positions
    #   expand: (B*Lt, B)  one-hot replication of each batch's context row
    pool = jnp.asarray(
        np.kron(np.eye(B, dtype=np.float32),
                np.full((1, Ls), 1.0 / Ls, np.float32)), dtype=jnp.bfloat16)
    expand = jnp.asarray(
        np.kron(np.eye(B, dtype=np.float32),
                np.ones((Lt, 1), np.float32)), dtype=jnp.bfloat16)

    flops = 2 * (B * Ls * HP * HP            # encoder matmul
                 + B * (B * Ls) * HP         # mean-pool matmul
                 + (B * Lt) * B * HP         # context replication matmul
                 + B * Lt * HP * HP          # decoder matmul
                 + B * Lt * HP * VP)         # generator matmul
    transcendentals = (B * Ls + B * Lt) * HP + B * Lt * VP + B * Lt
    bytes_accessed = (
        2 * (src_flat.size + tgt_flat.size + pool.size + expand.size
             + prepared["w_enc"].size + prepared["w_dec"].size
             + prepared["w_gen"].size)
        + 4 * (prepared["b_encdec"].size + prepared["b_gen"].size)
        + 4 * B * Lt * VP)

    out = pl.pallas_call(
        _seq2seq_kernel,
        out_shape=jax.ShapeDtypeStruct((B * Lt, VP), jnp.float32),
        # Single invocation (no grid): every operand is fully resident in VMEM
        # (~130 KiB total at these shapes -- far below any VMEM limit).
        in_specs=[pl.BlockSpec(memory_space=pltpu.MemorySpace.VMEM)] * 9,
        out_specs=pl.BlockSpec(memory_space=pltpu.MemorySpace.VMEM),
        compiler_params=pltpu.CompilerParams(vmem_limit_bytes=32 * 1024 * 1024),
        cost_estimate=pl.CostEstimate(flops=flops,
                                      transcendentals=transcendentals,
                                      bytes_accessed=bytes_accessed),
    )(src_flat, tgt_flat, pool, expand,
      prepared["w_enc"], prepared["w_dec"], prepared["b_encdec"],
      prepared["w_gen"], prepared["b_gen"])

    # Slice off padded vocab lanes inside the jit (fuses with the kernel's
    # consumer); reshape back to (B, Lt, V).
    return out[:, :vocab].reshape(B, Lt, vocab)


# ------------------------- pure-JAX f32 reference --------------------------


def _reference_forward(params, src_tok, src_special_tok, tgt_tok,
                       tgt_special_tok):
    src_emb = (params["learned_emb"][src_tok]
               + params["enc_special"][src_special_tok])
    tgt_emb = (params["learned_emb"][tgt_tok]
               + params["dec_special"][tgt_special_tok])
    enc = jnp.tanh(src_emb @ params["w_enc"] + params["b_enc"])
    ctx = enc.mean(axis=1, keepdims=True)
    dec = jnp.tanh((tgt_emb + ctx) @ params["w_dec"] + params["b_dec"])
    logits = dec @ params["w_gen"] + params["b_gen"]
    return jax.nn.log_softmax(logits, axis=-1)


# --------------------------------- main ------------------------------------

if __name__ == "__main__":
    B, Ls, Lt, H, V, S = 2, 8, 8, 32, 32, 8

    key = jax.random.PRNGKey(0)
    kp, k1, k2, k3, k4 = jax.random.split(key, 5)

    params = init_params(kp, vocab=V, special=S, hidden=H)
    prepared = prepare_params(params)          # one-time pad/cast/merge

    src_tok = jax.random.randint(k1, (B, Ls), 0, V)
    src_special_tok = jax.random.randint(k2, (B, Ls), 0, S)
    tgt_tok = jax.random.randint(k3, (B, Lt), 0, V)
    tgt_special_tok = jax.random.randint(k4, (B, Lt), 0, S)

    log_probs = simple_model_forward(prepared, src_tok, src_special_tok,
                                     tgt_tok, tgt_special_tok, vocab=V)
    jax.block_until_ready(log_probs)

    # Sanity 1: log-probs of each row should sum to 1 in prob space.
    probs_sum = jnp.exp(log_probs).sum(-1)
    assert log_probs.shape == (B, Lt, V)
    assert bool(jnp.allclose(probs_sum, 1.0, atol=1e-4))

    # Sanity 2: matches f32 pure-JAX reference (bf16 MXU operands => loose tol).
    ref = _reference_forward(params, src_tok, src_special_tok,
                             tgt_tok, tgt_special_tok)
    assert bool(jnp.allclose(log_probs, ref, atol=5e-2))

    print("KERNEL_OK")
</pallas_src>

<mosaic_0001>
module attributes {stable_mosaic.version = 11 : i64} {
  func.func @_seq2seq_kernel(%arg0: memref<16x128xbf16, #tpu.memory_space<vmem>>, %arg1: memref<16x128xbf16, #tpu.memory_space<vmem>>, %arg2: memref<2x16xbf16, #tpu.memory_space<vmem>>, %arg3: memref<16x2xbf16, #tpu.memory_space<vmem>>, %arg4: memref<128x128xbf16, #tpu.memory_space<vmem>>, %arg5: memref<128x128xbf16, #tpu.memory_space<vmem>>, %arg6: memref<2x128xf32, #tpu.memory_space<vmem>>, %arg7: memref<128x128xbf16, #tpu.memory_space<vmem>>, %arg8: memref<1x128xf32, #tpu.memory_space<vmem>>, %arg9: memref<16x128xf32, #tpu.memory_space<vmem>>) attributes {dimension_semantics = [], scalar_prefetch = 0 : i64, scratch_operands = 0 : i64, tpu.core_type = #tpu.core_type<tc>} {
    %c0 = arith.constant 0 : index
    %c0_0 = arith.constant 0 : index
    %0 = vector.load %arg0[%c0, %c0_0] : memref<16x128xbf16, #tpu.memory_space<vmem>>, vector<16x128xbf16>
    %c0_1 = arith.constant 0 : index
    %c0_2 = arith.constant 0 : index
    %1 = vector.load %arg4[%c0_1, %c0_2] : memref<128x128xbf16, #tpu.memory_space<vmem>>, vector<128x128xbf16>
    %cst = arith.constant dense<0.000000e+00> : vector<16x128xf32>
    %2 = tpu.matmul %0, %1, %cst {dimension_numbers = #tpu.dot_dimension_numbers<[1], [0], [0], [1], [0, 0, 1, 1], [], []>} : vector<16x128xbf16>, vector<128x128xbf16>, vector<16x128xf32> -> vector<16x128xf32>
    %c0_3 = arith.constant 0 : index
    %c0_4 = arith.constant 0 : index
    %3 = vector.load %arg6[%c0_3, %c0_4] : memref<2x128xf32, #tpu.memory_space<vmem>>, vector<1x128xf32>
    %4 = vector.broadcast %3 : vector<1x128xf32> to vector<16x128xf32>
    %5 = arith.addf %2, %4 : vector<16x128xf32>
    %6 = math.tanh %5 : vector<16x128xf32>
    %c0_5 = arith.constant 0 : index
    %c0_6 = arith.constant 0 : index
    %7 = vector.load %arg2[%c0_5, %c0_6] : memref<2x16xbf16, #tpu.memory_space<vmem>>, vector<2x16xbf16>
    %8 = arith.truncf %6 : vector<16x128xf32> to vector<16x128xbf16>
    %cst_7 = arith.constant dense<0.000000e+00> : vector<2x128xf32>
    %9 = tpu.matmul %7, %8, %cst_7 {dimension_numbers = #tpu.dot_dimension_numbers<[1], [0], [0], [1], [0, 0, 1, 1], [], []>} : vector<2x16xbf16>, vector<16x128xbf16>, vector<2x128xf32> -> vector<2x128xf32>
    %c0_8 = arith.constant 0 : index
    %c0_9 = arith.constant 0 : index
    %10 = vector.load %arg3[%c0_8, %c0_9] : memref<16x2xbf16, #tpu.memory_space<vmem>>, vector<16x2xbf16>
    %11 = arith.truncf %9 : vector<2x128xf32> to vector<2x128xbf16>
    %cst_10 = arith.constant dense<0.000000e+00> : vector<16x128xf32>
    %12 = tpu.matmul %10, %11, %cst_10 {dimension_numbers = #tpu.dot_dimension_numbers<[1], [0], [0], [1], [0, 0, 1, 1], [], []>} : vector<16x2xbf16>, vector<2x128xbf16>, vector<16x128xf32> -> vector<16x128xf32>
    %c0_11 = arith.constant 0 : index
    %c0_12 = arith.constant 0 : index
    %13 = vector.load %arg1[%c0_11, %c0_12] : memref<16x128xbf16, #tpu.memory_space<vmem>>, vector<16x128xbf16>
    %14 = arith.extf %13 : vector<16x128xbf16> to vector<16x128xf32>
    %15 = arith.addf %14, %12 : vector<16x128xf32>
    %16 = arith.truncf %15 : vector<16x128xf32> to vector<16x128xbf16>
    %c0_13 = arith.constant 0 : index
    %c0_14 = arith.constant 0 : index
    %17 = vector.load %arg5[%c0_13, %c0_14] : memref<128x128xbf16, #tpu.memory_space<vmem>>, vector<128x128xbf16>
    %cst_15 = arith.constant dense<0.000000e+00> : vector<16x128xf32>
    %18 = tpu.matmul %16, %17, %cst_15 {dimension_numbers = #tpu.dot_dimension_numbers<[1], [0], [0], [1], [0, 0, 1, 1], [], []>} : vector<16x128xbf16>, vector<128x128xbf16>, vector<16x128xf32> -> vector<16x128xf32>
    %c1 = arith.constant 1 : index
    %c0_16 = arith.constant 0 : index
    %19 = vector.load %arg6[%c1, %c0_16] : memref<2x128xf32, #tpu.memory_space<vmem>>, vector<1x128xf32>
    %20 = vector.broadcast %19 : vector<1x128xf32> to vector<16x128xf32>
    %21 = arith.addf %18, %20 : vector<16x128xf32>
    %22 = math.tanh %21 : vector<16x128xf32>
    %23 = arith.truncf %22 : vector<16x128xf32> to vector<16x128xbf16>
    %c0_17 = arith.constant 0 : index
    %c0_18 = arith.constant 0 : index
    %24 = vector.load %arg7[%c0_17, %c0_18] : memref<128x128xbf16, #tpu.memory_space<vmem>>, vector<128x128xbf16>
    %cst_19 = arith.constant dense<0.000000e+00> : vector<16x128xf32>
    %25 = tpu.matmul %23, %24, %cst_19 {dimension_numbers = #tpu.dot_dimension_numbers<[1], [0], [0], [1], [0, 0, 1, 1], [], []>} : vector<16x128xbf16>, vector<128x128xbf16>, vector<16x128xf32> -> vector<16x128xf32>
    %c0_20 = arith.constant 0 : index
    %c0_21 = arith.constant 0 : index
    %26 = vector.load %arg8[%c0_20, %c0_21] : memref<1x128xf32, #tpu.memory_space<vmem>>, vector<1x128xf32>
    %27 = vector.broadcast %26 : vector<1x128xf32> to vector<16x128xf32>
    %28 = arith.addf %25, %27 : vector<16x128xf32>
    %cst_22 = arith.constant dense<0xFF800000> : vector<16xf32>
    %29 = vector.multi_reduction <maximumf>, %28, %cst_22 [1] : vector<16x128xf32> to vector<16xf32>
    %30 = vector.shape_cast %29 : vector<16xf32> to vector<16x1xf32>
    %31 = vector.broadcast %30 : vector<16x1xf32> to vector<16x128xf32>
    %32 = arith.subf %28, %31 : vector<16x128xf32>
    %33 = math.exp %32 : vector<16x128xf32>
    %cst_23 = arith.constant dense<0.000000e+00> : vector<16xf32>
    %34 = vector.multi_reduction <add>, %33, %cst_23 [1] : vector<16x128xf32> to vector<16xf32>
    %35 = vector.shape_cast %34 : vector<16xf32> to vector<16x1xf32>
    %36 = math.log %35 : vector<16x1xf32>
    %37 = arith.addf %36, %30 : vector<16x1xf32>
    %38 = vector.broadcast %37 : vector<16x1xf32> to vector<16x128xf32>
    %39 = arith.subf %28, %38 : vector<16x128xf32>
    %c0_24 = arith.constant 0 : index
    %c0_25 = arith.constant 0 : index
    %40 = vector.load %arg9[%c0_24, %c0_25] : memref<16x128xf32, #tpu.memory_space<vmem>>, vector<16x128xf32>
    tpu.vector_store %arg9[%c0_24, %c0_25], %39 {strides = array<i32>} : memref<16x128xf32, #tpu.memory_space<vmem>>, vector<16x128xf32>,
    return
  }
}

</mosaic_0001>

<bundles_post_ra>
// kernel: simple_model_forward.1
= control target key start
LH: loop header
LB: loop body
LE: loop exit
PB: predicated region body
PF: predicated region fallthrough
CT: control target
= control target key end

     0   :  { %v698_v0 = vmov 0.0   ;;  %vm699_vm0 = vmmov 0   ;;  %vm155_vm1 = vcmask 130048   ;;  %vm211_vm2 = vcmask 1040384   ;;  %s885_s4 = inlined_call_operand.vmem [shape: bf16[128,128], index: 4, kind: input, shape index: {}]   ;;  %s886_s0 = inlined_call_operand.vmem [shape: bf16[16,128], index: 0, kind: input, shape index: {}]   ;;  %s887_s6 = inlined_call_operand.vmem [shape: f32[2,128], index: 6, kind: input, shape index: {}]   ;;  %s888_s2 = inlined_call_operand.vmem [shape: bf16[2,16], index: 2, kind: input, shape index: {}]   ;;  %s889_s3 = inlined_call_operand.vmem [shape: bf16[16,2], index: 3, kind: input, shape index: {}]   ;;  %s890_s5 = inlined_call_operand.vmem [shape: bf16[128,128], index: 5, kind: input, shape index: {}]   ;;  %s891_s7 = inlined_call_operand.vmem [shape: bf16[128,128], index: 7, kind: input, shape index: {}]   ;;  %s892_s1 = inlined_call_operand.vmem [shape: bf16[16,128], index: 1, kind: input, shape index: {}]   ;;  %s893_s8 = inlined_call_operand.vmem [shape: f32[1,128], index: 8, kind: input, shape index: {}]   ;;  %s894_s9 = inlined_call_operand.vmem [shape: f32[16,128], index: 9, kind: output, shape index: {}]  }
   0x1   :  { %582 = vmatprep.subr.bf16.mxu0 %v698_v0  ;;  %v656_v1 = vld [vmem:[%s885_s4] sm:$0xff]   ;;  %598 = vmatprep.mubr.msk.bf16.mxu0 %vm699_vm0, %v698_v0  ;;  %v657_v2 = vld [vmem:[%s885_s4 + $0x8] sm:$0xff]   ;;  %v658_v3 = vld [vmem:[%s885_s4 + $0x10] sm:$0xff]   ;;  %vm207_vm3 = vcmask 15360  }
   0x2   :  { %602 = vmatprep.subr.bf16.mxu1 %v698_v0  ;;  %604 = vmatprep.mubr.msk.bf16.mxu1 %vm699_vm0, %v698_v0  ;;  %v659_v4 = vld [vmem:[%s885_s4 + $0x18] sm:$0xff]   ;;  %v660_v5 = vld [vmem:[%s885_s4 + $0x20] sm:$0xff]   ;;  %v661_v6 = vld [vmem:[%s885_s4 + $0x28] sm:$0xff]  }
   0x3   :  { %583 = vmatpush3.bf16.msra.mxu0 %v656_v1  ;;  %v662_v7 = vld [vmem:[%s885_s4 + $0x30] sm:$0xff]   ;;  %v663_v8 = vld [vmem:[%s885_s4 + $0x38] sm:$0xff]   ;;  %v664_v9 = vld [vmem:[%s886_s0] sm:$0xff]  }
   0x4   :  { %584 = vmatprep.subr.bf16.mxu0 %v698_v0  ;;  %v516_v10 = vld [vmem:[%s887_s6] ss:$0 sm:$0xff]  ;;  %v667_v29 = vld [vmem:[%s890_s5 + $0x8] sm:$0xff]   ;;  %v668_v30 = vld [vmem:[%s890_s5 + $0x10] sm:$0xff]  }
   0x5   :  { %v153_v20 = vld [vmem:[%s888_s2] sm:$0x1]  ;;  %v669_v31 = vld [vmem:[%s890_s5 + $0x18] sm:$0xff]   ;;  %v671_v33 = vld [vmem:[%s890_s5 + $0x28] sm:$0xff]  }
   0x6   :  { %v665_v27 = vld [vmem:[%s889_s3] sm:$0xff]   ;;  %v672_v34 = vld [vmem:[%s890_s5 + $0x30] sm:$0xff]   ;;  %v673_v35 = vld [vmem:[%s890_s5 + $0x38] sm:$0xff]  }
   0x7   :  { %585 = vmatpush3.bf16.msra.mxu0 %v657_v2  ;;  %v666_v28 = vld [vmem:[%s890_s5] sm:$0xff]   ;;  %v675_v37 = vld [vmem:[%s891_s7 + $0x8] sm:$0xff]   ;;  %v676_v38 = vld [vmem:[%s891_s7 + $0x10] sm:$0xff]  }
   0x8   :  { %586 = vmatprep.subr.bf16.mxu0 %v698_v0  ;;  %v670_v32 = vld [vmem:[%s890_s5 + $0x20] sm:$0xff]   ;;  %v677_v39 = vld [vmem:[%s891_s7 + $0x18] sm:$0xff]   ;;  %v679_v51 = vld [vmem:[%s891_s7 + $0x28] sm:$0xff]  }
   0x9   :  { %v674_v36 = vld [vmem:[%s891_s7] sm:$0xff]   ;;  %v680_v52 = vld [vmem:[%s891_s7 + $0x30] sm:$0xff]   ;;  %v681_v53 = vld [vmem:[%s891_s7 + $0x38] sm:$0xff]  }
   0xa   :  { %v548_v40 = vld [vmem:[%s892_s1] sm:$0xff]  }
   0xb   :  { %587 = vmatpush3.bf16.msra.mxu0 %v658_v3  ;;  %v549_v41 = vunpack.c.l.bf16 %v548_v40  ;;  %v550_v42 = vunpack.c.h.bf16 %v548_v40  ;;  %v678_v50 = vld [vmem:[%s891_s7 + $0x20] sm:$0xff]  }
   0xc   :  { %588 = vmatprep.subr.bf16.mxu0 %v698_v0  ;;  %v529_v54 = vld [vmem:[%s887_s6 + $0x1] ss:$0 sm:$0xff] }
   0xf   :  { %589 = vmatpush3.bf16.msra.mxu0 %v659_v4 }
  0x10   :  { %590 = vmatprep.subr.bf16.mxu0 %v698_v0 }
  0x13   :  { %591 = vmatpush3.bf16.msra.mxu0 %v660_v5 }
  0x14   :  { %592 = vmatprep.subr.bf16.mxu0 %v698_v0 }
  0x17   :  { %593 = vmatpush3.bf16.msra.mxu0 %v661_v6 }
  0x18   :  { %594 = vmatprep.subr.bf16.mxu0 %v698_v0 }
  0x1b   :  { %595 = vmatpush3.bf16.msra.mxu0 %v662_v7 }
  0x1c   :  { %596 = vmatprep.subr.bf16.mxu0 %v698_v0 }
  0x1f   :  { %597 = vmatpush3.bf16.msra.mxu0 %v663_v8 }
  0x20   :  { %634 = vmatprep.subr.bf16.mxu0 %v698_v0 }
  0x22   :  { %599 = vmatmul.mubr.bf16.vlgmr.msra.gmra.mrb[0].mxu0 %v664_v9 }
  0x23   :  { %650 = vmatprep.mubr.msk.bf16.mxu0 %vm699_vm0, %v698_v0  ;;  %635 = vmatpush3.bf16.msra.mxu0 %v674_v36 }
  0x24   :  { %636 = vmatprep.subr.bf16.mxu0 %v698_v0 }
  0x27   :  { %637 = vmatpush3.bf16.msra.mxu0 %v675_v37 }
  0x28   :  { %638 = vmatprep.subr.bf16.mxu0 %v698_v0 }
  0x2b   :  { %639 = vmatpush3.bf16.msra.mxu0 %v676_v38 }
  0x2c   :  { %640 = vmatprep.subr.bf16.mxu0 %v698_v0 }
  0x2f   :  { %641 = vmatpush3.bf16.msra.mxu0 %v677_v39 }
  0x30   :  { %642 = vmatprep.subr.bf16.mxu0 %v698_v0 }
  0x33   :  { %643 = vmatpush3.bf16.msra.mxu0 %v678_v50 }
  0x34   :  { %644 = vmatprep.subr.bf16.mxu0 %v698_v0 }
  0x37   :  { %645 = vmatpush3.bf16.msra.mxu0 %v679_v51 }
  0x38   :  { %646 = vmatprep.subr.bf16.mxu0 %v698_v0 }
  0x3b   :  { %647 = vmatpush3.bf16.msra.mxu0 %v680_v52 }
  0x3c   :  { %648 = vmatprep.subr.bf16.mxu0 %v698_v0 }
  0x3f   :  { %649 = vmatpush3.bf16.msra.mxu0 %v681_v53 }
  0xf5   :  { %v144_v11 = vpop.f32.mrb[0].mxu0 }
  0xf6   :  { %v145_v12 = vadd.f32 %v516_v10, %v144_v11  ;;  %v600_v13 = vpop.f32.mrb[1].mxu0 }
  0xf7   :  { %v147_v14 = vpop.f32.mrb[2].mxu0 }
  0xf8   :  { %v148_v15 = vadd.f32 %v516_v10, %v147_v14  ;;  %v601_v16 = vpop.f32.mrb[3].mxu0  ;;  %682 = vtanh.f32 %v145_v12 }
  0xfa   :  { %684 = vtanh.f32 %v148_v15 }
 0x102   :  { %v683_v17 = vpop.eup %682 }
 0x104   :  { %v685_v18 = vpop.eup %684 }
 0x105   :  { %v154_v19 = vpack.c.bf16 %v685_v18, %v683_v17 }
 0x107   :  { %603 = vmatpush3.bf16.msra.mxu1 %v154_v19 }
 0x108   :  { %608 = vmatprep.subr.bf16.mxu1 %v698_v0 }
 0x10a   :  { %605 = vmatmul.mubr.msk.bf16.vlgmr.msra.gmra.mrb[0].mxu1 %vm155_vm1, %v153_v20 }
 0x10b   :  { %610 = vmatprep.mubr.msk.bf16.mxu1 %vm699_vm0, %v698_v0 }
 0x1dd   :  { %v193_v21 = vpop.f32.mrb[0].mxu1 }
 0x1de   :  { %v201_v22 = vpack.c.bf16 %v193_v21, %v193_v21  ;;  %v606_v23 = vpop.f32.mrb[1].mxu1 }
 0x1df   :  { %v196_v24 = vpop.f32.mrb[2].mxu1 }
 0x1e0   :  { %v213_v25 = vsel %vm211_vm2, %v201_v22, 0  ;;  %v607_v26 = vpop.f32.mrb[3].mxu1 }
 0x1e1   :  { %609 = vmatpush3.bf16.msra.mxu1 %v213_v25 }
 0x1e2   :  { %614 = vmatprep.subr.bf16.mxu1 %v698_v0 }
 0x1e4   :  { %611 = vmatmul.mubr.msk.bf16.vlgmr.msra.gmra.mrb[4].mxu1 %vm207_vm3, %v665_v27 }
 0x1e5   :  { %615 = vmatpush3.bf16.msra.mxu1 %v666_v28  ;;  %630 = vmatprep.mubr.msk.bf16.mxu1 %vm699_vm0, %v698_v0 }
 0x1e6   :  { %616 = vmatprep.subr.bf16.mxu1 %v698_v0 }
 0x1e9   :  { %617 = vmatpush3.bf16.msra.mxu1 %v667_v29 }
 0x1ea   :  { %618 = vmatprep.subr.bf16.mxu1 %v698_v0 }
 0x1ed   :  { %619 = vmatpush3.bf16.msra.mxu1 %v668_v30 }
 0x1ee   :  { %620 = vmatprep.subr.bf16.mxu1 %v698_v0 }
 0x1f1   :  { %621 = vmatpush3.bf16.msra.mxu1 %v669_v31 }
 0x1f2   :  { %622 = vmatprep.subr.bf16.mxu1 %v698_v0 }
 0x1f5   :  { %623 = vmatpush3.bf16.msra.mxu1 %v670_v32 }
 0x1f6   :  { %624 = vmatprep.subr.bf16.mxu1 %v698_v0 }
 0x1f9   :  { %625 = vmatpush3.bf16.msra.mxu1 %v671_v33 }
 0x1fa   :  { %626 = vmatprep.subr.bf16.mxu1 %v698_v0 }
 0x1fd   :  { %627 = vmatpush3.bf16.msra.mxu1 %v672_v34 }
 0x1fe   :  { %628 = vmatprep.subr.bf16.mxu1 %v698_v0  ;;  %v538_v0 = vld [vmem:[%s893_s8] ss:$0 sm:$0xff] }
 0x201   :  { %629 = vmatpush3.bf16.msra.mxu1 %v673_v35 }
 0x2b7   :  { %v249_v43 = vpop.f32.mrb[4].mxu1 }
 0x2b8   :  { %v612_v44 = vpop.f32.mrb[5].mxu1  ;;  %v260_v46 = vadd.f32 %v549_v41, %v249_v43 }
 0x2b9   :  { %v252_v45 = vpop.f32.mrb[6].mxu1 }
 0x2ba   :  { %v261_v47 = vadd.f32 %v550_v42, %v252_v45  ;;  %v613_v48 = vpop.f32.mrb[7].mxu1 }
 0x2bc   :  { %v262_v49 = vpack.c.bf16 %v261_v47, %v260_v46 }
 0x2be   :  { %631 = vmatmul.mubr.bf16.vlgmr.msra.gmra.mrb[8].mxu1 %v262_v49 }
 0x391   :  { %v366_v55 = vpop.f32.mrb[8].mxu1 }
 0x392   :  { %v367_v56 = vadd.f32 %v529_v54, %v366_v55  ;;  %v632_v57 = vpop.f32.mrb[9].mxu1 }
 0x393   :  { %v369_v58 = vpop.f32.mrb[10].mxu1 }
 0x394   :  { %v370_v59 = vadd.f32 %v529_v54, %v369_v58  ;;  %v633_v60 = vpop.f32.mrb[11].mxu1  ;;  %686 = vtanh.f32 %v367_v56 }
 0x396   :  { %688 = vtanh.f32 %v370_v59 }
 0x39e   :  { %v687_v61 = vpop.eup %686 }
 0x3a0   :  { %v689_v62 = vpop.eup %688 }
 0x3a1   :  { %v375_v63 = vpack.c.bf16 %v689_v62, %v687_v61 }
 0x3a3   :  { %651 = vmatmul.mubr.bf16.vlgmr.msra.gmra.mrb[4].mxu0 %v375_v63 }
 0x476   :  { %v481_v1 = vpop.f32.mrb[4].mxu0 }
 0x477   :  { %v482_v2 = vadd.f32 %v538_v0, %v481_v1  ;;  %v652_v3 = vpop.f32.mrb[5].mxu0 }
 0x478   :  { %v484_v4 = vpop.f32.mrb[6].mxu0 }
 0x479   :  { %488 = vmax.xlane.f32.xlu0 %v482_v2  ;;  %v653_v5 = vpop.f32.mrb[7].mxu0  ;;  %v485_v6 = vadd.f32 %v538_v0, %v484_v4 }
 0x47d   :  { %490 = vmax.xlane.f32.xlu0 %v485_v6 }
 0x506   :  { %v489_v7 = vpop.xlane.xlu0 %488 }
 0x507   :  { %v492_v8 = vsub.f32 %v482_v2, %v489_v7 }
 0x509   :  { %v494_v9 = vmul.f32 1.442695, %v492_v8 }
 0x50a   :  { %v491_v10 = vpop.xlane.xlu0 %490 }
 0x50b   :  { %v493_v11 = vsub.f32 %v485_v6, %v491_v10  ;;  %690 = vpow2.f32 %v494_v9 }
 0x50d   :  { %v496_v12 = vmul.f32 1.442695, %v493_v11 }
 0x50f   :  { %692 = vpow2.f32 %v496_v12 }
 0x515   :  { %v691_v13 = vpop.eup %690 }
 0x516   :  { %498 = vadd.xlane.f32.xlu1 %v691_v13 }
 0x519   :  { %v693_v14 = vpop.eup %692 }
 0x51a   :  { %500 = vadd.xlane.f32.xlu1 %v693_v14 }
 0x5a3   :  { %v499_v15 = vpop.xlane.xlu1 %498 }
 0x5a4   :  { %694 = vlog2.f32 %v499_v15 }
 0x5a7   :  { %v501_v16 = vpop.xlane.xlu1 %500 }
 0x5a8   :  { %696 = vlog2.f32 %v501_v16 }
 0x5ae   :  { %v695_v17 = vpop.eup %694 }
 0x5af   :  { %v503_v18 = vmul.f32 0.6931472, %v695_v17 }
 0x5b1   :  { %v506_v19 = vadd.f32 %v503_v18, %v489_v7 }
 0x5b2   :  { %v697_v20 = vpop.eup %696 }
 0x5b3   :  { %v508_v21 = vsub.f32 %v482_v2, %v506_v19  ;;  %v505_v22 = vmul.f32 0.6931472, %v697_v20 }
 0x5b5   :  { %510 = vst [vmem:[%s894_s9] sm:$0xff] %v508_v21  ;;  %v507_v23 = vadd.f32 %v505_v22, %v491_v10 }
 0x5b7   :  { %v509_v24 = vsub.f32 %v485_v6, %v507_v23 }
 0x5b9   :  { %511 = vst [vmem:[%s894_s9 + $0x8] sm:$0xff] %v509_v24 }

</bundles_post_ra>
